<compile_context>
chip_gen: v5e
topology: v5e:2x2
jax: 0.10.0
libtpu: 0.0.40
codegen_flags: <defaults>
</compile_context>

<pallas_src>
import functools

import jax
import jax.numpy as jnp
from jax.experimental import pallas as pl
from jax.experimental.pallas import tpu as pltpu


def _round_up(x, m):
    return ((x + m - 1) // m) * m


def forces_kernel(x_ref, w1t_ref, b1_ref, w2_ref, ut_ref, b2_ref,
                  f_ref, e_ref):
    # x_ref:   (3, TA)   coords, xyz on sublanes, atoms on lanes (lane-dense)
    # w1t_ref: (Hp, 3)   W1^T, rows H..Hp-1 zero-padded
    # b1_ref:  (Hp, 1)
    # w2_ref:  (Hp, 1)   zero-padded
    # ut_ref:  (Hp, 3)   U^T with U = W1 * w2^T (w2 folded in; zero-padded)
    # b2_ref:  (1, 1)
    # f_ref:   (3, TA)   forces (lane-dense)
    # e_ref:   (1, TA)   per-atom energy (lane-dense)
    x = x_ref[...]
    w1t = w1t_ref[...]
    b1 = b1_ref[...]
    w2 = w2_ref[...]
    ut = ut_ref[...]

    # ---- forward: z[h,a] = sum_d W1[d,h] x[d,a] + b1[h] ----
    # K=3 contraction -> three VPU outer products (MXU would be ~1% utilized).
    z = (w1t[:, 0:1] * x[0:1, :]
         + w1t[:, 1:2] * x[1:2, :]
         + w1t[:, 2:3] * x[2:3, :]
         + b1)                                    # (Hp, TA)
    t = jnp.tanh(z)                               # EUP

    # per-atom energy: e[a] = sum_h w2[h] t[h,a] + b2  (weighted sublane
    # reduce — no width-1 MXU matmul).
    e_ref[...] = jnp.sum(t * w2, axis=0, keepdims=True) + b2_ref[...]

    # ---- backward (analytic autograd): dE/dx[d,a] = sum_h U[d,h](1-t^2)[h,a]
    s = 1.0 - t * t
    g0 = jnp.sum(s * ut[:, 0:1], axis=0, keepdims=True)
    g1 = jnp.sum(s * ut[:, 1:2], axis=0, keepdims=True)
    g2 = jnp.sum(s * ut[:, 2:3], axis=0, keepdims=True)
    f_ref[0:1, :] = -g0
    f_ref[1:2, :] = -g1
    f_ref[2:3, :] = -g2


@functools.partial(jax.jit, static_argnames=("tile_atoms", "hidden_pad"))
def forces_pallas(coord, w1, b1, w2, b2, *, tile_atoms=1024, hidden_pad=128):
    """coord: [B, N, 3] f32.  Returns (forces [B,N,3], energy [B])."""
    B, N, D = coord.shape
    assert D == 3
    H = w1.shape[1]
    A = B * N

    Hp = _round_up(H, hidden_pad)
    A128 = _round_up(A, 128)
    TA = min(tile_atoms, A128)          # lane-tile; multiple of 128
    A_pad = _round_up(A, TA)

    # lane-dense layout: atoms on the lane axis, xyz on the sublane axis.
    coord_t = jnp.transpose(coord, (2, 0, 1)).reshape(D, A)
    coord_t = jnp.pad(coord_t, ((0, 0), (0, A_pad - A)))

    # zero-pad params along H: padded w2/U columns are zero => no leakage
    # into energy or forces (exact).
    w1t = jnp.pad(w1.T, ((0, Hp - H), (0, 0)))                 # (Hp, 3)
    b1c = jnp.pad(b1.reshape(H, 1), ((0, Hp - H), (0, 0)))     # (Hp, 1)
    w2c = jnp.pad(w2.reshape(H, 1), ((0, Hp - H), (0, 0)))     # (Hp, 1)
    u_t = w1t * w2c                                            # (Hp, 3) folded
    b2m = b2.reshape(1, 1)

    grid = (A_pad // TA,)
    forces_t, e_atom = pl.pallas_call(
        forces_kernel,
        out_shape=(jax.ShapeDtypeStruct((D, A_pad), jnp.float32),   # forces
                   jax.ShapeDtypeStruct((1, A_pad), jnp.float32)),  # e/atom
        grid=grid,
        in_specs=[
            pl.BlockSpec((D, TA), lambda i: (0, i)),    # coord (3, TA)
            pl.BlockSpec((Hp, D), lambda i: (0, 0)),    # W1^T
            pl.BlockSpec((Hp, 1), lambda i: (0, 0)),    # b1
            pl.BlockSpec((Hp, 1), lambda i: (0, 0)),    # w2
            pl.BlockSpec((Hp, D), lambda i: (0, 0)),    # U^T (w2 folded)
            pl.BlockSpec((1, 1),  lambda i: (0, 0)),    # b2
        ],
        out_specs=(
            pl.BlockSpec((D, TA), lambda i: (0, i)),    # forces
            pl.BlockSpec((1, TA), lambda i: (0, i)),    # per-atom energy
        ),
        compiler_params=pltpu.CompilerParams(
            dimension_semantics=("parallel",),
            vmem_limit_bytes=32 * 1024 * 1024),
    )(coord_t, w1t, b1c, w2c, u_t, b2m)

    forces = forces_t[:, :A].reshape(D, B, N).transpose(1, 2, 0)   # [B,N,3]
    energy = jnp.sum(e_atom[0, :A].reshape(B, N), axis=1)          # [B]
    return forces, energy


def forces_forward(data, params):
    """Mirror of Forces.forward: data dict in, dict with 'energy'/'forces' out."""
    w1, b1, w2, b2 = params
    forces, energy = forces_pallas(data["coord"], w1, b1, w2, b2)
    out = dict(data)
    out["energy"] = energy
    out["forces"] = forces
    return out


# Pure-JAX reference (uses jax.grad, mirroring torch.autograd.grad semantics).
def _energy_ref(coord, w1, b1, w2, b2):
    z = jnp.einsum("bnd,dh->bnh", coord, w1) + b1
    t = jnp.tanh(z)
    e_atom = jnp.einsum("bnh,ho->bno", t, w2) + b2[0, 0]
    return jnp.sum(e_atom, axis=(1, 2))


def _forces_ref(coord, w1, b1, w2, b2):
    g = jax.grad(lambda c: jnp.sum(_energy_ref(c, w1, b1, w2, b2)))(coord)
    return -g, _energy_ref(coord, w1, b1, w2, b2)


if __name__ == "__main__":
    B, N, D, H = 2, 8, 3, 32   # batch molecules, atoms, xyz, hidden

    key = jax.random.PRNGKey(0)
    k_coord, k_w1, k_b1, k_w2 = jax.random.split(key, 4)

    coord = jax.random.normal(k_coord, (B, N, D), dtype=jnp.float32)
    w1 = 0.5 * jax.random.normal(k_w1, (D, H), dtype=jnp.float32)
    b1 = 0.1 * jax.random.normal(k_b1, (1, H), dtype=jnp.float32)
    w2 = 0.5 * jax.random.normal(k_w2, (H, 1), dtype=jnp.float32)
    b2 = jnp.full((1, 1), 0.05, dtype=jnp.float32)
    params = (w1, b1, w2, b2)

    data = {"coord": coord}
    out = forces_forward(data, params)
    jax.block_until_ready(out["forces"])
    jax.block_until_ready(out["energy"])

    # Check against jax.grad reference (the torch.autograd.grad equivalent).
    f_ref, e_ref = _forces_ref(coord, w1, b1, w2, b2)
    assert jnp.allclose(out["forces"], f_ref, atol=1e-4, rtol=1e-4)
    assert jnp.allclose(out["energy"], e_ref, atol=1e-4, rtol=1e-4)

    print("KERNEL_OK")
</pallas_src>

<mosaic_0001>
module attributes {stable_mosaic.version = 11 : i64} {
  func.func @forces_kernel(%arg0: i32, %arg1: memref<3x128xf32, #tpu.memory_space<vmem>>, %arg2: memref<128x3xf32, #tpu.memory_space<vmem>>, %arg3: memref<128x1xf32, #tpu.memory_space<vmem>>, %arg4: memref<128x1xf32, #tpu.memory_space<vmem>>, %arg5: memref<128x3xf32, #tpu.memory_space<vmem>>, %arg6: memref<1x1xf32, #tpu.memory_space<vmem>>, %arg7: memref<3x128xf32, #tpu.memory_space<vmem>>, %arg8: memref<1x128xf32, #tpu.memory_space<vmem>>) attributes {dimension_semantics = [#tpu.dimension_semantics<parallel>], iteration_bounds = array<i64: 1>, scalar_prefetch = 0 : i64, scratch_operands = 0 : i64, tpu.core_type = #tpu.core_type<tc>, window_params = [{transform_indices = @transform_0, window_bounds = array<i64: 3, 128>}, {pipeline_mode = #tpu.pipeline_mode<synchronous>, transform_indices = @transform_1, window_bounds = array<i64: 128, 3>}, {pipeline_mode = #tpu.pipeline_mode<synchronous>, transform_indices = @transform_2, window_bounds = array<i64: 128, 1>}, {pipeline_mode = #tpu.pipeline_mode<synchronous>, transform_indices = @transform_3, window_bounds = array<i64: 128, 1>}, {pipeline_mode = #tpu.pipeline_mode<synchronous>, transform_indices = @transform_4, window_bounds = array<i64: 128, 3>}, {pipeline_mode = #tpu.pipeline_mode<synchronous>, transform_indices = @transform_5, window_bounds = array<i64: 1, 1>}, {transform_indices = @transform_6, window_bounds = array<i64: 3, 128>}, {transform_indices = @transform_7, window_bounds = array<i64: 1, 128>}]} {
    %c0 = arith.constant 0 : index
    %c0_0 = arith.constant 0 : index
    %0 = vector.load %arg1[%c0, %c0_0] : memref<3x128xf32, #tpu.memory_space<vmem>>, vector<3x128xf32>
    %c0_1 = arith.constant 0 : index
    %c0_2 = arith.constant 0 : index
    %1 = vector.load %arg2[%c0_1, %c0_2] : memref<128x3xf32, #tpu.memory_space<vmem>>, vector<128x3xf32>
    %c0_3 = arith.constant 0 : index
    %c0_4 = arith.constant 0 : index
    %2 = vector.load %arg3[%c0_3, %c0_4] : memref<128x1xf32, #tpu.memory_space<vmem>>, vector<128x1xf32>
    %c0_5 = arith.constant 0 : index
    %c0_6 = arith.constant 0 : index
    %3 = vector.load %arg4[%c0_5, %c0_6] : memref<128x1xf32, #tpu.memory_space<vmem>>, vector<128x1xf32>
    %c0_7 = arith.constant 0 : index
    %c0_8 = arith.constant 0 : index
    %4 = vector.load %arg5[%c0_7, %c0_8] : memref<128x3xf32, #tpu.memory_space<vmem>>, vector<128x3xf32>
    %5 = vector.extract_strided_slice %1 {offsets = [0, 0], sizes = [128, 1], strides = [1, 1]} : vector<128x3xf32> to vector<128x1xf32>
    %6 = vector.extract_strided_slice %0 {offsets = [0, 0], sizes = [1, 128], strides = [1, 1]} : vector<3x128xf32> to vector<1x128xf32>
    %7 = vector.broadcast %5 : vector<128x1xf32> to vector<128x128xf32>
    %8 = vector.broadcast %6 : vector<1x128xf32> to vector<128x128xf32>
    %9 = arith.mulf %7, %8 : vector<128x128xf32>
    %10 = vector.extract_strided_slice %1 {offsets = [0, 1], sizes = [128, 1], strides = [1, 1]} : vector<128x3xf32> to vector<128x1xf32>
    %11 = vector.extract_strided_slice %0 {offsets = [1, 0], sizes = [1, 128], strides = [1, 1]} : vector<3x128xf32> to vector<1x128xf32>
    %12 = vector.broadcast %10 : vector<128x1xf32> to vector<128x128xf32>
    %13 = vector.broadcast %11 : vector<1x128xf32> to vector<128x128xf32>
    %14 = arith.mulf %12, %13 : vector<128x128xf32>
    %15 = arith.addf %9, %14 : vector<128x128xf32>
    %16 = vector.extract_strided_slice %1 {offsets = [0, 2], sizes = [128, 1], strides = [1, 1]} : vector<128x3xf32> to vector<128x1xf32>
    %17 = vector.extract_strided_slice %0 {offsets = [2, 0], sizes = [1, 128], strides = [1, 1]} : vector<3x128xf32> to vector<1x128xf32>
    %18 = vector.broadcast %16 : vector<128x1xf32> to vector<128x128xf32>
    %19 = vector.broadcast %17 : vector<1x128xf32> to vector<128x128xf32>
    %20 = arith.mulf %18, %19 : vector<128x128xf32>
    %21 = arith.addf %15, %20 : vector<128x128xf32>
    %22 = vector.broadcast %2 : vector<128x1xf32> to vector<128x128xf32>
    %23 = arith.addf %21, %22 : vector<128x128xf32>
    %24 = math.tanh %23 : vector<128x128xf32>
    %25 = vector.broadcast %3 : vector<128x1xf32> to vector<128x128xf32>
    %26 = arith.mulf %24, %25 : vector<128x128xf32>
    %cst = arith.constant dense<0.000000e+00> : vector<128xf32>
    %27 = vector.multi_reduction <add>, %26, %cst [0] : vector<128x128xf32> to vector<128xf32>
    %28 = vector.shape_cast %27 : vector<128xf32> to vector<1x128xf32>
    %c0_9 = arith.constant 0 : index
    %c0_10 = arith.constant 0 : index
    %29 = vector.load %arg6[%c0_9, %c0_10] : memref<1x1xf32, #tpu.memory_space<vmem>>, vector<1x1xf32>
    %30 = vector.broadcast %29 : vector<1x1xf32> to vector<1x128xf32>
    %31 = arith.addf %28, %30 : vector<1x128xf32>
    %c0_11 = arith.constant 0 : index
    %c0_12 = arith.constant 0 : index
    %32 = vector.load %arg8[%c0_11, %c0_12] : memref<1x128xf32, #tpu.memory_space<vmem>>, vector<1x128xf32>
    tpu.vector_store %arg8[%c0_11, %c0_12], %31 {strides = array<i32>} : memref<1x128xf32, #tpu.memory_space<vmem>>, vector<1x128xf32>,
    %33 = arith.mulf %24, %24 : vector<128x128xf32>
    %cst_13 = arith.constant 1.000000e+00 : f32
    %34 = vector.broadcast %cst_13 : f32 to vector<128x128xf32>
    %35 = arith.subf %34, %33 : vector<128x128xf32>
    %36 = vector.extract_strided_slice %4 {offsets = [0, 0], sizes = [128, 1], strides = [1, 1]} : vector<128x3xf32> to vector<128x1xf32>
    %37 = vector.broadcast %36 : vector<128x1xf32> to vector<128x128xf32>
    %38 = arith.mulf %35, %37 : vector<128x128xf32>
    %cst_14 = arith.constant dense<0.000000e+00> : vector<128xf32>
    %39 = vector.multi_reduction <add>, %38, %cst_14 [0] : vector<128x128xf32> to vector<128xf32>
    %40 = vector.shape_cast %39 : vector<128xf32> to vector<1x128xf32>
    %41 = vector.extract_strided_slice %4 {offsets = [0, 1], sizes = [128, 1], strides = [1, 1]} : vector<128x3xf32> to vector<128x1xf32>
    %42 = vector.broadcast %41 : vector<128x1xf32> to vector<128x128xf32>
    %43 = arith.mulf %35, %42 : vector<128x128xf32>
    %cst_15 = arith.constant dense<0.000000e+00> : vector<128xf32>
    %44 = vector.multi_reduction <add>, %43, %cst_15 [0] : vector<128x128xf32> to vector<128xf32>
    %45 = vector.shape_cast %44 : vector<128xf32> to vector<1x128xf32>
    %46 = vector.extract_strided_slice %4 {offsets = [0, 2], sizes = [128, 1], strides = [1, 1]} : vector<128x3xf32> to vector<128x1xf32>
    %47 = vector.broadcast %46 : vector<128x1xf32> to vector<128x128xf32>
    %48 = arith.mulf %35, %47 : vector<128x128xf32>
    %cst_16 = arith.constant dense<0.000000e+00> : vector<128xf32>
    %49 = vector.multi_reduction <add>, %48, %cst_16 [0] : vector<128x128xf32> to vector<128xf32>
    %50 = vector.shape_cast %49 : vector<128xf32> to vector<1x128xf32>
    %cst_17 = arith.constant 0.000000e+00 : f32
    %51 = vector.broadcast %cst_17 : f32 to vector<1x128xf32>
    %52 = arith.subf %51, %40 : vector<1x128xf32>
    %c0_18 = arith.constant 0 : index
    %c0_19 = arith.constant 0 : index
    %53 = vector.load %arg7[%c0_18, %c0_19] : memref<3x128xf32, #tpu.memory_space<vmem>>, vector<1x128xf32>
    tpu.vector_store %arg7[%c0_18, %c0_19], %52 {strides = array<i32>} : memref<3x128xf32, #tpu.memory_space<vmem>>, vector<1x128xf32>,
    %cst_20 = arith.constant 0.000000e+00 : f32
    %54 = vector.broadcast %cst_20 : f32 to vector<1x128xf32>
    %55 = arith.subf %54, %45 : vector<1x128xf32>
    %c1 = arith.constant 1 : index
    %c0_21 = arith.constant 0 : index
    %56 = vector.load %arg7[%c1, %c0_21] : memref<3x128xf32, #tpu.memory_space<vmem>>, vector<1x128xf32>
    tpu.vector_store %arg7[%c1, %c0_21], %55 {strides = array<i32>} : memref<3x128xf32, #tpu.memory_space<vmem>>, vector<1x128xf32>,
    %cst_22 = arith.constant 0.000000e+00 : f32
    %57 = vector.broadcast %cst_22 : f32 to vector<1x128xf32>
    %58 = arith.subf %57, %50 : vector<1x128xf32>
    %c2 = arith.constant 2 : index
    %c0_23 = arith.constant 0 : index
    %59 = vector.load %arg7[%c2, %c0_23] : memref<3x128xf32, #tpu.memory_space<vmem>>, vector<1x128xf32>
    tpu.vector_store %arg7[%c2, %c0_23], %58 {strides = array<i32>} : memref<3x128xf32, #tpu.memory_space<vmem>>, vector<1x128xf32>,
    return
  }
  func.func @transform_0(%arg0: i32) -> (i32, i32) {
    %c0_i32 = arith.constant 0 : i32
    %c0_i32_0 = arith.constant 0 : i32
    return %c0_i32, %arg0 : i32, i32
  }
  func.func @transform_1(%arg0: i32) -> (i32, i32) {
    %c0_i32 = arith.constant 0 : i32
    %c0_i32_0 = arith.constant 0 : i32
    %c0_i32_1 = arith.constant 0 : i32
    return %c0_i32, %c0_i32_0 : i32, i32
  }
  func.func @transform_2(%arg0: i32) -> (i32, i32) {
    %c0_i32 = arith.constant 0 : i32
    %c0_i32_0 = arith.constant 0 : i32
    %c0_i32_1 = arith.constant 0 : i32
    return %c0_i32, %c0_i32_0 : i32, i32
  }
  func.func @transform_3(%arg0: i32) -> (i32, i32) {
    %c0_i32 = arith.constant 0 : i32
    %c0_i32_0 = arith.constant 0 : i32
    %c0_i32_1 = arith.constant 0 : i32
    return %c0_i32, %c0_i32_0 : i32, i32
  }
  func.func @transform_4(%arg0: i32) -> (i32, i32) {
    %c0_i32 = arith.constant 0 : i32
    %c0_i32_0 = arith.constant 0 : i32
    %c0_i32_1 = arith.constant 0 : i32
    return %c0_i32, %c0_i32_0 : i32, i32
  }
  func.func @transform_5(%arg0: i32) -> (i32, i32) {
    %c0_i32 = arith.constant 0 : i32
    %c0_i32_0 = arith.constant 0 : i32
    %c0_i32_1 = arith.constant 0 : i32
    return %c0_i32, %c0_i32_0 : i32, i32
  }
  func.func @transform_6(%arg0: i32) -> (i32, i32) {
    %c0_i32 = arith.constant 0 : i32
    %c0_i32_0 = arith.constant 0 : i32
    return %c0_i32, %arg0 : i32, i32
  }
  func.func @transform_7(%arg0: i32) -> (i32, i32) {
    %c0_i32 = arith.constant 0 : i32
    %c0_i32_0 = arith.constant 0 : i32
    return %c0_i32, %arg0 : i32, i32
  }
}

</mosaic_0001>

<bundles_post_ra>
// kernel: squeeze.1
= control target key start
LH: loop header
LB: loop body
LE: loop exit
PB: predicated region body
PF: predicated region fallthrough
CT: control target
= control target key end

     0   :  { %vm7_vm0 = vcmask 64512   ;;  %s39_s0 = inlined_call_operand.vmem [shape: f32[16], index: 0, kind: input, shape index: {}]   ;;  %s40_s1 = inlined_call_operand.vmem [shape: f32[2,8], index: 1, kind: output, shape index: {}]  }
   0x1   :  { %v4_v0 = vld [vmem:[%s39_s0] sm:$0x1]  ;;  %s22_s0 = smov 120  }
   0x2   :  { %5 = vst [vmem:[#allocation1] sm:$0x1] %v4_v0 }
   0x9   :  { %v9_v1 = vld [vmem:[#allocation1] sm:$0x1]  }
   0xa   :  { %v6_v2 = vld [vmem:[#allocation1] sm:$0x1]   ;;  %10 = vrot.lane.b32.xlu0 %v9_v1, %s22_s0 }
   0xb   :  { %8 = vst.msk [vmem:[#allocation0] sm:$0x1] %vm7_vm0, %v6_v2  }
  0x7c   :  { %v11_v3 = vpop.permute.xlu0 %10  }
  0x7d   :  { %14 = vst.msk [vmem:[#allocation0 + $0x1] sm:$0x1] %vm7_vm0, %v11_v3  }
  0x84   :  { %v17_v4 = vld [vmem:[#allocation0] sm:$0x3] }
  0x85   :  { %20 = vst [vmem:[%s40_s1] sm:$0x3] %v17_v4 }

// kernel: forces_pallas.1
= control target key start
LH: loop header
LB: loop body
LE: loop exit
PB: predicated region body
PF: predicated region fallthrough
CT: control target
= control target key end

     0   :  { %v1036_v0 = vmov 0   ;;  %v1854_v17 = vmov 1   ;;  %v1852_v24 = vmov 2   ;;  %s1844_s1 = inlined_call_operand.vmem [shape: f32[128,3], index: 1, kind: input, shape index: {}]   ;;  %s1845_s2 = inlined_call_operand.vmem [shape: f32[128,1], index: 2, kind: input, shape index: {}]   ;;  %s1846_s3 = inlined_call_operand.vmem [shape: f32[128,1], index: 3, kind: input, shape index: {}]   ;;  %s1847_s0 = inlined_call_operand.vmem [shape: f32[3,128], index: 0, kind: input, shape index: {}]   ;;  %s1848_s4 = inlined_call_operand.vmem [shape: f32[128,3], index: 4, kind: input, shape index: {}]   ;;  %s1849_s5 = inlined_call_operand.<no memory space> [shape: f32[1,1], index: 5, kind: input, shape index: {}]   ;;  %s1850_s7 = inlined_call_operand.vmem [shape: f32[1,128], index: 7, kind: output, shape index: {1}]   ;;  %s1851_s6 = inlined_call_operand.vmem [shape: f32[3,128], index: 6, kind: output, shape index: {0}]  }
   0x1   :  { %991 = vset.pattern.permute.xlu2 %v1036_v0  ;;  %990 = vset.pattern.permute.xlu1 %v1036_v0  ;;  %v1084_v1 = vld [vmem:[%s1844_s1 + $0x20] sm:$0xff]  ;;  %v1089_v2 = vld [vmem:[%s1844_s1 + $0x10] sm:$0xff]  ;;  %v1103_v4 = vld [vmem:[%s1844_s1 + $0x28] sm:$0xff] }
   0x2   :  { %v1094_v3 = vld [vmem:[%s1844_s1] sm:$0xff]  ;;  %989 = vset.pattern.permute.xlu0 %v1036_v0  ;;  %114 = vperm.xlu2 %991, %v1084_v1   ;;  %v1108_v5 = vld [vmem:[%s1844_s1 + $0x18] sm:$0xff]  ;;  %v29_v6 = vld [vmem:[%s1844_s1 + $0x8] sm:$0xff] }
   0x3   :  { %104 = vperm.xlu1 %990, %v1089_v2   ;;  %94 = vperm.xlu0 %989, %v1094_v3   ;;  %v1118_v7 = vld [vmem:[%s1844_s1 + $0x40] sm:$0xff]  ;;  %v1123_v8 = vld [vmem:[%s1844_s1 + $0x38] sm:$0xff]  ;;  %v34_v9 = vld [vmem:[%s1844_s1 + $0x30] sm:$0xff] }
   0x4   :  { %v1133_v10 = vld [vmem:[%s1844_s1 + $0x58] sm:$0xff]  ;;  %v1138_v11 = vld [vmem:[%s1844_s1 + $0x50] sm:$0xff]  ;;  %v37_v12 = vld [vmem:[%s1844_s1 + $0x48] sm:$0xff] }
   0x5   :  { %v1148_v13 = vld [vmem:[%s1844_s1 + $0x70] sm:$0xff]  ;;  %v1153_v14 = vld [vmem:[%s1844_s1 + $0x68] sm:$0xff]  ;;  %v1158_v15 = vld [vmem:[%s1844_s1 + $0x60] sm:$0xff] }
   0x6   :  { %v1166_v16 = vld [vmem:[%s1844_s1 + $0x78] sm:$0xff]  ;;  %v45_v18 = vld [vmem:[%s1845_s2 + $0x8] sm:$0xff]  ;;  %v50_v19 = vld [vmem:[%s1845_s2 + $0x30] sm:$0xff] }
   0x7   :  { %v53_v20 = vld [vmem:[%s1845_s2 + $0x48] sm:$0xff]  ;;  %v56_v21 = vld [vmem:[%s1845_s2 + $0x60] sm:$0xff]  ;;  %v59_v22 = vld [vmem:[%s1845_s2 + $0x78] sm:$0xff] }
   0x8   :  { %v62_v23 = vld [vmem:[%s1846_s3 + $0x10] sm:$0xff]  ;;  %v65_v26 = vld [vmem:[%s1846_s3 + $0x28] sm:$0xff]  ;;  %v68_v28 = vld [vmem:[%s1846_s3 + $0x40] sm:$0xff] }
   0x9   :  { %v71_v30 = vld [vmem:[%s1846_s3 + $0x58] sm:$0xff]  ;;  %v74_v34 = vld [vmem:[%s1846_s3 + $0x70] sm:$0xff]  ;;  %v1234_v38 = vld [vmem:[%s1847_s0] sm:$0x7] }
   0xa   :  { %119 = vperm.xlu2 %991, %v1103_v4   ;;  %v1239_v39 = vld [vmem:[%s1848_s4] sm:$0xff]  ;;  %v1242_v40 = vperm.slane %v1234_v38, 0  ;;  %v1254_v45 = vperm.slane %v1234_v38, 1  ;;  %v1260_v48 = vld [vmem:[%s1848_s4 + $0x18] sm:$0xff]  ;;  %v46_v51 = vld [vmem:[%s1845_s2 + $0x10] sm:$0xff] }
   0xb   :  { %109 = vperm.xlu1 %990, %v1108_v5   ;;  %99 = vperm.xlu0 %989, %v29_v6   ;;  %v44_v41 = vld [vmem:[%s1845_s2] sm:$0xff]  ;;  %v47_v50 = vld [vmem:[%s1845_s2 + $0x18] sm:$0xff]  ;;  %v1279_v57 = vld [vmem:[%s1848_s4 + $0x30] sm:$0xff] }
   0xc   :  { %v49_v59 = vld [vmem:[%s1845_s2 + $0x28] sm:$0xff]  ;;  %v48_v60 = vld [vmem:[%s1845_s2 + $0x20] sm:$0xff] }
  0x12   :  { %134 = vperm.xlu2 %991, %v1118_v7  }
  0x13   :  { %129 = vperm.xlu1 %990, %v1123_v8   ;;  %124 = vperm.xlu0 %989, %v34_v9  }
  0x1a   :  { %149 = vperm.xlu2 %991, %v1133_v10  }
  0x1b   :  { %144 = vperm.xlu1 %990, %v1138_v11   ;;  %139 = vperm.xlu0 %989, %v37_v12  }
  0x22   :  { %164 = vperm.xlu2 %991, %v1148_v13  }
  0x23   :  { %159 = vperm.xlu1 %990, %v1153_v14   ;;  %154 = vperm.xlu0 %989, %v1158_v15  }
  0x2a   :  { %993 = vset.pattern.permute.xlu2 %v1854_v17 }
  0x2b   :  { %992 = vset.pattern.permute.xlu1 %v1854_v17  ;;  %169 = vperm.xlu0 %989, %v1166_v16  }
  0x2c   :  { %194 = vperm.xlu2 %993, %v29_v6   ;;  %190 = vperm.xlu1 %992, %v1094_v3  }
  0x33   :  { %390 = vperm.xlu0 %989, %v45_v18  }
  0x34   :  { %206 = vperm.xlu2 %993, %v1084_v1   ;;  %202 = vperm.xlu1 %992, %v1108_v5  }
  0x3b   :  { %415 = vperm.xlu0 %989, %v50_v19  }
  0x3c   :  { %214 = vperm.xlu2 %993, %v34_v9   ;;  %210 = vperm.xlu1 %992, %v1103_v4  }
  0x43   :  { %430 = vperm.xlu0 %989, %v53_v20  }
  0x44   :  { %226 = vperm.xlu2 %993, %v37_v12   ;;  %222 = vperm.xlu1 %992, %v1118_v7  }
  0x4b   :  { %445 = vperm.xlu0 %989, %v56_v21  }
  0x4c   :  { %238 = vperm.xlu2 %993, %v1158_v15   ;;  %234 = vperm.xlu1 %992, %v1133_v10  }
  0x53   :  { %460 = vperm.xlu0 %989, %v59_v22  }
  0x54   :  { %250 = vperm.xlu2 %993, %v1166_v16   ;;  %246 = vperm.xlu1 %992, %v1148_v13  }
  0x5b   :  { %507 = vperm.xlu0 %989, %v62_v23   ;;  %v1315_v23 = vld [vmem:[%s1848_s4 + $0x60] sm:$0xff] }
  0x5c   :  { %995 = vset.pattern.permute.xlu2 %v1852_v24  ;;  %994 = vset.pattern.permute.xlu1 %v1852_v24  ;;  %v115_v25 = vpop.permute.xlu2 %114 }
  0x5d   :  { %295 = vperm.xlu2 %995, %v1089_v2   ;;  %291 = vperm.xlu1 %994, %v29_v6   ;;  %v177_v55 = vmul.f32 %v1242_v40, %v115_v25 }
  0x63   :  { %522 = vperm.xlu0 %989, %v65_v26  }
  0x64   :  { %v1204_v27 = vpop.permute.xlu2 %119 }
  0x65   :  { %303 = vperm.xlu2 %995, %v1084_v1   ;;  %299 = vperm.xlu1 %994, %v1108_v5   ;;  %v1297_v5 = vld [vmem:[%s1848_s4 + $0x48] sm:$0xff] }
  0x6b   :  { %537 = vperm.xlu0 %989, %v68_v28   ;;  %v55_v28 = vld [vmem:[%s1845_s2 + $0x58] sm:$0xff] }
  0x6c   :  { %v1211_v29 = vpop.permute.xlu2 %134 }
  0x6d   :  { %315 = vperm.xlu2 %995, %v1123_v8   ;;  %311 = vperm.xlu1 %994, %v34_v9   ;;  %v52_v9 = vld [vmem:[%s1845_s2 + $0x40] sm:$0xff] }
  0x73   :  { %552 = vperm.xlu0 %989, %v71_v30   ;;  %v54_v30 = vld [vmem:[%s1845_s2 + $0x50] sm:$0xff] }
  0x74   :  { %v1217_v31 = vpop.permute.xlu2 %149 }
  0x75   :  { %v1219_v32 = vpop.permute.xlu1 %104  ;;  %327 = vperm.xlu2 %995, %v1138_v11   ;;  %323 = vperm.xlu1 %994, %v37_v12   ;;  %v95_v33 = vpop.permute.xlu0 %94  ;;  %v51_v12 = vld [vmem:[%s1845_s2 + $0x38] sm:$0xff] }
  0x7b   :  { %567 = vperm.xlu0 %989, %v74_v34  }
  0x7c   :  { %v1225_v35 = vpop.permute.xlu2 %164 }
  0x7d   :  { %v1227_v36 = vpop.permute.xlu1 %109  ;;  %339 = vperm.xlu2 %995, %v1153_v14   ;;  %335 = vperm.xlu1 %994, %v1158_v15   ;;  %v100_v37 = vpop.permute.xlu0 %99  ;;  %v173_v15 = vmul.f32 %v1242_v40, %v95_v33 }
  0x7e   :  { %v174_v42 = vmul.f32 %v1242_v40, %v100_v37 }
  0x83   :  { %655 = vperm.xlu0 %989, %v1239_v39  }
  0x85   :  { %v1249_v43 = vpop.permute.xlu1 %129  ;;  %996 = vset.pattern.permute.xlu2 %v1036_v0  ;;  %347 = vperm.xlu1 %994, %v1166_v16   ;;  %v125_v44 = vpop.permute.xlu0 %124 }
  0x86   :  { %385 = vperm.xlu2 %996, %v44_v41   ;;  %v195_v46 = vpop.permute.xlu2 %194  ;;  %v179_v61 = vmul.f32 %v1242_v40, %v125_v44  ;;  %v176_v41 = vmul.f32 %v1242_v40, %v1227_v36  ;;  %v58_v36 = vld [vmem:[%s1845_s2 + $0x70] sm:$0xff] }
  0x87   :  { %v255_v47 = vmul.f32 %v1254_v45, %v195_v46 }
  0x89   :  { %v1262_v49 = vadd.f32 %v255_v47, %v174_v42  ;;  %v1338_v47 = vld [vmem:[%s1848_s4 + $0x78] sm:$0xff] }
  0x8b   :  { %670 = vperm.xlu0 %989, %v1260_v48  }
  0x8d   :  { %v1271_v52 = vpop.permute.xlu1 %144  ;;  %997 = vset.pattern.permute.xlu1 %v1036_v0  ;;  %v140_v53 = vpop.permute.xlu0 %139 }
  0x8e   :  { %400 = vperm.xlu2 %996, %v47_v50   ;;  %v207_v54 = vpop.permute.xlu2 %206  ;;  %395 = vperm.xlu1 %997, %v46_v51   ;;  %v182_v16 = vmul.f32 %v1242_v40, %v140_v53  ;;  %v57_v53 = vld [vmem:[%s1845_s2 + $0x68] sm:$0xff] }
  0x8f   :  { %v258_v56 = vmul.f32 %v1254_v45, %v207_v54 }
  0x91   :  { %v1281_v58 = vadd.f32 %v258_v56, %v177_v55 }
  0x93   :  { %685 = vperm.xlu0 %989, %v1279_v57  }
  0x95   :  { %v1291_v62 = vpop.permute.xlu1 %159  ;;  %v155_v63 = vpop.permute.xlu0 %154 }
  0x96   :  { %410 = vperm.xlu2 %996, %v49_v59   ;;  %v215_v0 = vpop.permute.xlu2 %214  ;;  %405 = vperm.xlu1 %997, %v48_v60   ;;  %v185_v42 = vmul.f32 %v1242_v40, %v155_v63  ;;  %v178_v59 = vmul.f32 %v1242_v40, %v1204_v27  ;;  %v60_v27 = vld [vmem:[%s1846_s3] sm:$0xff] }
  0x97   :  { %v260_v1 = vmul.f32 %v1254_v45, %v215_v0 }
  0x99   :  { %v1299_v6 = vadd.f32 %v260_v1, %v179_v61 }
  0x9b   :  { %700 = vperm.xlu0 %989, %v1297_v5  }
  0x9d   :  { %v170_v18 = vpop.permute.xlu0 %169 }
  0x9e   :  { %425 = vperm.xlu2 %996, %v52_v9   ;;  %v227_v19 = vpop.permute.xlu2 %226  ;;  %420 = vperm.xlu1 %997, %v51_v12   ;;  %v191_v20 = vpop.permute.xlu1 %190  ;;  %v188_v60 = vmul.f32 %v1242_v40, %v170_v18  ;;  %v61_v9 = vld [vmem:[%s1846_s3 + $0x8] sm:$0xff]  ;;  %v181_v18 = vmul.f32 %v1242_v40, %v1211_v29 }
  0x9f   :  { %v263_v21 = vmul.f32 %v1254_v45, %v227_v19  ;;  %v254_v22 = vmul.f32 %v1254_v45, %v191_v20 }
  0xa1   :  { %v1317_v25 = vadd.f32 %v263_v21, %v182_v16  ;;  %v1319_v26 = vadd.f32 %v254_v22, %v173_v15  ;;  %v13_v15 = vstv %s1849_s5  ;;  %v63_v22 = vld [vmem:[%s1846_s3 + $0x18] sm:$0xff] }
  0xa2   :  { %14 = vst [vmem:[#allocation2] sm:$0x1] %v13_v15  ;;  %v72_v15 = vld [vmem:[%s1846_s3 + $0x60] sm:$0xff] }
  0xa3   :  { %715 = vperm.xlu0 %989, %v1315_v23  }
  0xa5   :  { %v1328_v33 = vpop.permute.xlu0 %390 }
  0xa6   :  { %440 = vperm.xlu2 %996, %v55_v28   ;;  %v239_v34 = vpop.permute.xlu2 %238  ;;  %435 = vperm.xlu1 %997, %v54_v30   ;;  %v203_v37 = vpop.permute.xlu1 %202  ;;  %v1389_v28 = vperm.slane %v1234_v38, 2 }
  0xa7   :  { %v266_v44 = vmul.f32 %v1254_v45, %v239_v34  ;;  %v257_v46 = vmul.f32 %v1254_v45, %v203_v37  ;;  %v184_v34 = vmul.f32 %v1242_v40, %v1217_v31 }
  0xa9   :  { %v1340_v50 = vadd.f32 %v266_v44, %v185_v42  ;;  %v1342_v51 = vadd.f32 %v257_v46, %v176_v41  ;;  %v66_v46 = vld [vmem:[%s1846_s3 + $0x30] sm:$0xff] }
  0xab   :  { %730 = vperm.xlu0 %989, %v1338_v47  }
  0xad   :  { %v1351_v54 = vpop.permute.xlu0 %415 }
  0xae   :  { %455 = vperm.xlu2 %996, %v58_v36   ;;  %v251_v55 = vpop.permute.xlu2 %250  ;;  %450 = vperm.xlu1 %997, %v57_v53   ;;  %v211_v56 = vpop.permute.xlu1 %210  ;;  %v187_v53 = vmul.f32 %v1242_v40, %v1225_v35 }
  0xaf   :  { %v269_v61 = vmul.f32 %v1254_v45, %v251_v55  ;;  %v259_v63 = vmul.f32 %v1254_v45, %v211_v56 }
  0xb1   :  { %v1358_v0 = vadd.f32 %v269_v61, %v188_v60  ;;  %v1360_v1 = vadd.f32 %v259_v63, %v178_v59  ;;  %v70_v59 = vld [vmem:[%s1846_s3 + $0x50] sm:$0xff] }
  0xb3   :  { %998 = vset.pattern.permute.xlu0 %v1854_v17 }
  0xb4   :  { %198 = vperm.xlu0 %998, %v1089_v2   ;;  %v64_v2 = vld [vmem:[%s1846_s3 + $0x20] sm:$0xff] }
  0xb5   :  { %v1370_v12 = vpop.permute.xlu0 %430 }
  0xb6   :  { %502 = vperm.xlu2 %996, %v61_v9   ;;  %497 = vperm.xlu1 %997, %v60_v27   ;;  %v223_v16 = vpop.permute.xlu1 %222  ;;  %v1434_v9 = vld [vmem:[%s1848_s4 + $0x10] sm:$0xff] }
  0xb7   :  { %v262_v19 = vmul.f32 %v1254_v45, %v223_v16  ;;  %v1378_v20 = vpop.permute.xlu2 %295 }
  0xb9   :  { %v1380_v21 = vadd.f32 %v262_v19, %v181_v18 }
  0xbc   :  { %218 = vperm.xlu0 %998, %v1123_v8   ;;  %v67_v8 = vld [vmem:[%s1846_s3 + $0x38] sm:$0xff] }
  0xbd   :  { %v1392_v29 = vpop.permute.xlu0 %445 }
  0xbe   :  { %517 = vperm.xlu2 %996, %v64_v2   ;;  %512 = vperm.xlu1 %997, %v63_v22   ;;  %v235_v30 = vpop.permute.xlu1 %234  ;;  %v1455_v22 = vld [vmem:[%s1848_s4 + $0x38] sm:$0xff] }
  0xbf   :  { %v265_v37 = vmul.f32 %v1254_v45, %v235_v30  ;;  %v304_v41 = vpop.permute.xlu2 %303 }
  0xc0   :  { %v355_v42 = vmul.f32 %v1389_v28, %v304_v41 }
  0xc1   :  { %v1398_v44 = vadd.f32 %v265_v37, %v184_v34  ;;  %v75_v34 = vld [vmem:[%s1846_s3 + $0x78] sm:$0xff] }
  0xc2   :  { %v1401_v38 = vadd.f32 %v355_v42, %v1281_v58 }
  0xc4   :  { %230 = vperm.xlu0 %998, %v1138_v11   ;;  %v69_v11 = vld [vmem:[%s1846_s3 + $0x48] sm:$0xff] }
  0xc5   :  { %v1410_v31 = vpop.permute.xlu0 %460 }
  0xc6   :  { %532 = vperm.xlu2 %996, %v67_v8   ;;  %527 = vperm.xlu1 %997, %v66_v46   ;;  %v247_v36 = vpop.permute.xlu1 %246 }
  0xc7   :  { %v268_v58 = vmul.f32 %v1254_v45, %v247_v36  ;;  %v1415_v55 = vpop.permute.xlu2 %315  ;;  %v1476_v36 = vld [vmem:[%s1848_s4 + $0x8] sm:$0xff] }
  0xc9   :  { %v1417_v56 = vadd.f32 %v268_v58, %v187_v53 }
  0xcb   :  { %1866 = vst [vmem:[#allocation3_spill] sm:$0xff] %v1417_v56 }
  0xcc   :  { %242 = vperm.xlu0 %998, %v1153_v14   ;;  %v73_v14 = vld [vmem:[%s1846_s3 + $0x68] sm:$0xff] }
  0xcd   :  { %v1426_v60 = vpop.permute.xlu0 %507 }
  0xce   :  { %547 = vperm.xlu2 %996, %v70_v59   ;;  %542 = vperm.xlu1 %997, %v69_v11  }
  0xcf   :  { %v1428_v35 = vpop.permute.xlu2 %327  ;;  %v292_v61 = vpop.permute.xlu1 %291 }
  0xd0   :  { %v352_v63 = vmul.f32 %v1389_v28, %v292_v61 }
  0xd2   :  { %v368_v27 = vadd.f32 %v352_v63, %v1262_v49  ;;  %v1488_v63 = vld [vmem:[%s1848_s4 + $0x68] sm:$0xff] }
  0xd4   :  { %v1444_v16 = vadd.f32 %v1328_v33, %v368_v27  ;;  %779 = vperm.xlu0 %998, %v1434_v9   ;;  %v612_v33 = vld [vmem:[#allocation2] sm:$0x1]  ;;  %v1494_v27 = vld [vmem:[%s1848_s4 + $0x28] sm:$0xff] }
  0xd5   :  { %v1447_v18 = vpop.permute.xlu0 %522 }
  0xd6   :  { %562 = vperm.xlu2 %996, %v73_v14   ;;  %557 = vperm.xlu1 %997, %v72_v15   ;;  %v1499_v14 = vld [vmem:[%s1848_s4 + $0x20] sm:$0xff] }
  0xd7   :  { %v1449_v19 = vpop.permute.xlu2 %339  ;;  %v300_v49 = vpop.permute.xlu1 %299 }
  0xd8   :  { %v354_v2 = vmul.f32 %v1389_v28, %v300_v49 }
  0xda   :  { %v370_v30 = vadd.f32 %v354_v2, %v1342_v51  ;;  %v1470_v51 = vld [vmem:[%s1848_s4 + $0x50] sm:$0xff] }
  0xdc   :  { %799 = vperm.xlu0 %998, %v1455_v22  }
  0xdd   :  { %v1462_v37 = vpop.permute.xlu0 %537 }
  0xde   :  { %615 = vperm.xlu2 %996, %v612_v33   ;;  %572 = vperm.xlu1 %997, %v75_v34  }
  0xdf   :  { %v312_v41 = vpop.permute.xlu1 %311 }
  0xe0   :  { %v357_v42 = vmul.f32 %v1389_v28, %v312_v41  ;;  %v1465_v8 = vpop.permute.xlu2 %385 }
  0xe2   :  { %v373_v46 = vadd.f32 %v357_v42, %v1299_v6 }
  0xe4   :  { %v469_v53 = vadd.f32 %v1351_v54, %v373_v46  ;;  %811 = vperm.xlu0 %998, %v1470_v51  }
  0xe5   :  { %v1480_v58 = vpop.permute.xlu0 %552 }
  0xe6   :  { %1867 = vst [vmem:[#allocation4_spill] sm:$0xff] %v1480_v58  ;;  %665 = vperm.xlu2 %996, %v1434_v9   ;;  %660 = vperm.xlu1 %997, %v1476_v36  }
  0xe7   :  { %v324_v59 = vpop.permute.xlu1 %323 }
  0xe8   :  { %v360_v11 = vmul.f32 %v1389_v28, %v324_v59  ;;  %v401_v61 = vpop.permute.xlu2 %400 }
  0xe9   :  { %v466_v6 = vadd.f32 %v401_v61, %v370_v30 }
  0xea   :  { %v376_v54 = vadd.f32 %v360_v11, %v1317_v25 }
  0xeb   :  { %1004 = vtanh.f32 %v466_v6 }
  0xec   :  { %v472_v15 = vadd.f32 %v1370_v12, %v376_v54  ;;  %823 = vperm.xlu0 %998, %v1488_v63   ;;  %v1514_v12 = vld [vmem:[%s1848_s4 + $0x40] sm:$0xff]  ;;  %1006 = vtanh.f32 %v469_v53 }
  0xed   :  { %v1503_v49 = vpop.permute.xlu0 %567 }
  0xee   :  { %1868 = vst [vmem:[#allocation5_spill] sm:$0xff] %v1503_v49  ;;  %680 = vperm.xlu2 %996, %v1494_v27   ;;  %675 = vperm.xlu1 %997, %v1499_v14   ;;  %1008 = vtanh.f32 %v472_v15 }
  0xef   :  { %v336_v25 = vpop.permute.xlu1 %335 }
  0xf0   :  { %v363_v2 = vmul.f32 %v1389_v28, %v336_v25  ;;  %v1508_v30 = vpop.permute.xlu2 %410 }
  0xf1   :  { %v1518_v41 = vpop.eup %1004 }
  0xf2   :  { %v379_v33 = vadd.f32 %v363_v2, %v1340_v50  ;;  %v1539_v53 = vpop.eup %1006 }
  0xf4   :  { %v475_v34 = vadd.f32 %v1392_v29, %v379_v33  ;;  %1001 = vset.pattern.permute.xlu0 %v1852_v24  ;;  %v624_v29 = vmul.f32 %v1518_v41, %v1518_v41 }
  0xf5   :  { %287 = vperm.xlu0 %1001, %v1094_v3   ;;  %v1521_v42 = vpop.permute.xlu0 %655  ;;  %v1534_v3 = vld [vmem:[%s1848_s4 + $0x58] sm:$0xff] }
  0xf6   :  { %695 = vperm.xlu2 %996, %v1514_v12   ;;  %690 = vperm.xlu1 %997, %v1455_v22   ;;  %v1537_v6 = vsub.f32 1.0, %v624_v29  ;;  %1010 = vtanh.f32 %v475_v34  ;;  %v1875_v34 = vmov 1  }
  0xf7   :  { %v348_v50 = vpop.permute.xlu1 %347  ;;  %1012 = vtanh.f32 %v1444_v16 }
  0xf8   :  { %v366_v46 = vmul.f32 %v1389_v28, %v348_v50  ;;  %v1526_v59 = vpop.permute.xlu2 %425  ;;  %1869 = vst [vmem:[#allocation6_spill] sm:$0xff] %v1537_v6  ;;  %v1560_v50 = vpop.eup %1008 }
  0xfa   :  { %v382_v11 = vadd.f32 %v366_v46, %v1358_v0 }
  0xfc   :  { %v478_v61 = vadd.f32 %v1410_v31, %v382_v11  ;;  %v627_v31 = vmul.f32 %v1539_v53, %v1539_v53  ;;  %v1576_v24 = vpop.eup %1010 }
  0xfd   :  { %307 = vperm.xlu0 %1001, %v1103_v4   ;;  %v671_v54 = vpop.permute.xlu0 %670  ;;  %v1556_v4 = vld [vmem:[%s1848_s4 + $0x70] sm:$0xff] }
  0xfe   :  { %v1543_v25 = vmul.f32 %v671_v54, %v1537_v6  ;;  %710 = vperm.xlu2 %996, %v1534_v3   ;;  %705 = vperm.xlu1 %997, %v1470_v51   ;;  %v1558_v33 = vsub.f32 1.0, %v627_v31  ;;  %v630_v54 = vmul.f32 %v1560_v50, %v1560_v50  ;;  %1014 = vtanh.f32 %v478_v61 }
 0x100   :  { %v1547_v0 = vpop.permute.xlu2 %440  ;;  %v1549_v2 = vpop.permute.xlu1 %395  ;;  %1870 = vst [vmem:[#allocation7_spill] sm:$0xff] %v1558_v33 }
 0x105   :  { %319 = vperm.xlu0 %1001, %v1118_v7   ;;  %v686_v46 = vpop.permute.xlu0 %685  ;;  %v1574_v7 = vsub.f32 1.0, %v630_v54 }
 0x106   :  { %v1564_v15 = vmul.f32 %v686_v46, %v1558_v33  ;;  %725 = vperm.xlu2 %996, %v1556_v4   ;;  %720 = vperm.xlu1 %997, %v1488_v63  }
 0x107   :  { %1873 = vst [vmem:[#allocation10_spill] sm:$0xff] %v1574_v7 }
 0x108   :  { %1871 = vst [vmem:[#allocation8_spill] sm:$0xff] %v1564_v15  ;;  %v1568_v29 = vpop.permute.xlu2 %455  ;;  %v406_v11 = vpop.permute.xlu1 %405 }
 0x109   :  { %1872 = vst [vmem:[#allocation9_spill] sm:$0xff] %v1568_v29  ;;  %v467_v31 = vadd.f32 %v406_v11, %v1401_v38  ;;  %v1586_v38 = vpop.eup %1012 }
 0x10b   :  { %1016 = vtanh.f32 %v467_v31 }
 0x10d   :  { %331 = vperm.xlu0 %1001, %v1133_v10   ;;  %v701_v46 = vpop.permute.xlu0 %700  ;;  %v633_v10 = vmul.f32 %v1576_v24, %v1576_v24 }
 0x10e   :  { %v1580_v17 = vmul.f32 %v701_v46, %v1574_v7  ;;  %1000 = vset.pattern.permute.xlu2 %v1875_v34  ;;  %999 = vset.pattern.permute.xlu1 %v1875_v34  ;;  %v1595_v7 = vpop.eup %1014 }
 0x10f   :  { %775 = vperm.xlu2 %1000, %v1476_v36   ;;  %771 = vperm.xlu1 %999, %v1239_v39   ;;  %v1593_v46 = vsub.f32 1.0, %v633_v10  ;;  %v636_v31 = vmul.f32 %v1595_v7, %v1595_v7 }
 0x110   :  { %1874 = vst [vmem:[#allocation11_spill] sm:$0xff] %v1580_v17  ;;  %v503_v16 = vpop.permute.xlu2 %502  ;;  %v421_v11 = vpop.permute.xlu1 %420 }
 0x111   :  { %v1591_v54 = vmul.f32 %v1586_v38, %v503_v16  ;;  %1876 = vst [vmem:[#allocation12_spill] sm:$0xff] %v1593_v46  ;;  %v1603_v49 = vpop.eup %1016  ;;  %v1610_v17 = vsub.f32 1.0, %v636_v31 }
 0x113   :  { %1878 = vst [vmem:[#allocation14_spill] sm:$0xff] %v1610_v17 }
 0x115   :  { %343 = vperm.xlu0 %1001, %v1148_v13   ;;  %v716_v61 = vpop.permute.xlu0 %715 }
 0x116   :  { %v1599_v34 = vmul.f32 %v716_v61, %v1593_v46 }
 0x117   :  { %787 = vperm.xlu2 %1000, %v1499_v14   ;;  %783 = vperm.xlu1 %999, %v1260_v48  }
 0x118   :  { %1877 = vst [vmem:[#allocation13_spill] sm:$0xff] %v1599_v34  ;;  %v518_v33 = vpop.permute.xlu2 %517  ;;  %v436_v16 = vpop.permute.xlu1 %435 }
 0x119   :  { %v1608_v10 = vmul.f32 %v1603_v49, %v518_v33  ;;  %v175_v33 = vmul.f32 %v1242_v40, %v1219_v32  ;;  %v180_v32 = vmul.f32 %v1242_v40, %v1249_v43 }
 0x11d   :  { %872 = vperm.xlu0 %1001, %v1239_v39   ;;  %v731_v13 = vpop.permute.xlu0 %730 }
 0x11e   :  { %v1614_v61 = vmul.f32 %v731_v13, %v1610_v17  ;;  %v353_v17 = vmul.f32 %v1389_v28, %v1378_v20  ;;  %v358_v20 = vmul.f32 %v1389_v28, %v1415_v55 }
 0x11f   :  { %795 = vperm.xlu2 %1000, %v1279_v57   ;;  %791 = vperm.xlu1 %999, %v1494_v27  }
 0x120   :  { %1879 = vst [vmem:[#allocation15_spill] sm:$0xff] %v1614_v61  ;;  %v533_v46 = vpop.permute.xlu2 %532  ;;  %v451_v34 = vpop.permute.xlu1 %450 }
 0x125   :  { %892 = vperm.xlu0 %1001, %v1494_v27  }
 0x126   :  { %v199_v58 = vpop.permute.xlu0 %198 }
 0x127   :  { %v256_v31 = vmul.f32 %v1254_v45, %v199_v58  ;;  %807 = vperm.xlu2 %1000, %v1297_v5   ;;  %803 = vperm.xlu1 %999, %v1514_v12  }
 0x128   :  { %v548_v39 = vpop.permute.xlu2 %547  ;;  %v1624_v13 = vpop.permute.xlu1 %497 }
 0x129   :  { %v272_v61 = vadd.f32 %v256_v31, %v175_v33 }
 0x12b   :  { %v369_v29 = vadd.f32 %v353_v17, %v272_v61 }
 0x12d   :  { %v465_v27 = vadd.f32 %v1549_v2, %v369_v29  ;;  %904 = vperm.xlu0 %1001, %v1514_v12  }
 0x12e   :  { %v219_v6 = vpop.permute.xlu0 %218 }
 0x12f   :  { %v261_v58 = vmul.f32 %v1254_v45, %v219_v6  ;;  %819 = vperm.xlu2 %1000, %v1315_v23   ;;  %815 = vperm.xlu1 %999, %v1534_v3   ;;  %v183_v6 = vmul.f32 %v1242_v40, %v1271_v52 }
 0x130   :  { %v563_v56 = vpop.permute.xlu2 %562  ;;  %v513_v15 = vpop.permute.xlu1 %512 }
 0x131   :  { %v277_v17 = vadd.f32 %v261_v58, %v180_v32  ;;  %v1638_v2 = vmul.f32 %v1518_v41, %v513_v15  ;;  %v361_v15 = vmul.f32 %v1389_v28, %v1428_v35 }
 0x133   :  { %v374_v12 = vadd.f32 %v358_v20, %v277_v17  ;;  %v186_v20 = vmul.f32 %v1242_v40, %v1291_v62  ;;  %v1880_v17 = vmov 2  }
 0x135   :  { %v470_v29 = vadd.f32 %v421_v11, %v374_v12  ;;  %916 = vperm.xlu0 %1001, %v1534_v3  }
 0x136   :  { %v231_v43 = vpop.permute.xlu0 %230 }
 0x137   :  { %1018 = vtanh.f32 %v470_v29  ;;  %v264_v61 = vmul.f32 %v1254_v45, %v231_v43  ;;  %831 = vperm.xlu2 %1000, %v1338_v47   ;;  %827 = vperm.xlu1 %999, %v1556_v4  }
 0x138   :  { %1020 = vtanh.f32 %v465_v27  ;;  %v1646_v55 = vpop.permute.xlu2 %615  ;;  %v528_v41 = vpop.permute.xlu1 %527 }
 0x139   :  { %v280_v11 = vadd.f32 %v264_v61, %v183_v6  ;;  %v1651_v3 = vmul.f32 %v1539_v53, %v528_v41 }
 0x13b   :  { %v377_v33 = vadd.f32 %v361_v15, %v280_v11 }
 0x13d   :  { %v1019_v52 = vpop.eup %1018  ;;  %v473_v31 = vadd.f32 %v436_v16, %v377_v33  ;;  %928 = vperm.xlu0 %1001, %v1556_v4  }
 0x13e   :  { %v1654_v32 = vpop.eup %1020  ;;  %v1656_v58 = vmul.f32 %v1019_v52, %v533_v46  ;;  %v243_v27 = vpop.permute.xlu0 %242  ;;  %v364_v46 = vmul.f32 %v1389_v28, %v1449_v19 }
 0x13f   :  { %1022 = vtanh.f32 %v473_v31  ;;  %v267_v35 = vmul.f32 %v1254_v45, %v243_v27  ;;  %1003 = vset.pattern.permute.xlu2 %v1880_v17  ;;  %1002 = vset.pattern.permute.xlu1 %v1880_v17  ;;  %v623_v40 = vmul.f32 %v1654_v32, %v1654_v32 }
 0x140   :  { %880 = vperm.xlu2 %1003, %v1434_v9   ;;  %v1664_v53 = vpop.permute.xlu2 %665  ;;  %876 = vperm.xlu1 %1002, %v1476_v36   ;;  %v543_v4 = vpop.permute.xlu1 %542 }
 0x141   :  { %v283_v16 = vadd.f32 %v267_v35, %v186_v20  ;;  %v1672_v45 = vmul.f32 %v1560_v50, %v543_v4  ;;  %v1674_v43 = vsub.f32 1.0, %v623_v40 }
 0x143   :  { %v380_v62 = vadd.f32 %v364_v46, %v283_v16 }
 0x145   :  { %v1023_v12 = vpop.eup %1022  ;;  %v476_v29 = vadd.f32 %v451_v34, %v380_v62  ;;  %v628_v34 = vmul.f32 %v1019_v52, %v1019_v52 }
 0x146   :  { %v1676_v9 = vmul.f32 %v1023_v12, %v548_v39  ;;  %v780_v6 = vpop.permute.xlu0 %779  ;;  %v631_v52 = vmul.f32 %v1023_v12, %v1023_v12 }
 0x147   :  { %1024 = vtanh.f32 %v476_v29  ;;  %v1679_v36 = vmul.f32 %v780_v6, %v1674_v43  ;;  %v1688_v15 = vsub.f32 1.0, %v628_v34 }
 0x148   :  { %888 = vperm.xlu2 %1003, %v1499_v14   ;;  %v1682_v19 = vpop.permute.xlu2 %680  ;;  %884 = vperm.xlu1 %1002, %v1260_v48   ;;  %v558_v50 = vpop.permute.xlu1 %557  ;;  %v1702_v31 = vsub.f32 1.0, %v631_v52 }
 0x149   :  { %v1686_v61 = vmul.f32 %v1576_v24, %v558_v50  ;;  %v622_v50 = vmul.f32 %v1586_v38, %v1586_v38 }
 0x14d   :  { %v1025_v41 = vpop.eup %1024 }
 0x14e   :  { %v1690_v39 = vmul.f32 %v1025_v41, %v563_v56  ;;  %v800_v11 = vpop.permute.xlu0 %799  ;;  %v634_v20 = vmul.f32 %v1025_v41, %v1025_v41 }
 0x14f   :  { %v1693_v33 = vmul.f32 %v800_v11, %v1688_v15  ;;  %v1734_v11 = vsub.f32 1.0, %v622_v50 }
 0x150   :  { %900 = vperm.xlu2 %1003, %v1455_v22   ;;  %v1696_v14 = vpop.permute.xlu2 %695  ;;  %896 = vperm.xlu1 %1002, %v1279_v57   ;;  %v573_v48 = vpop.permute.xlu1 %572  ;;  %v1711_v57 = vsub.f32 1.0, %v634_v20 }
 0x151   :  { %v1700_v24 = vmul.f32 %v1595_v7, %v573_v48 }
 0x156   :  { %v812_v27 = vpop.permute.xlu0 %811 }
 0x157   :  { %v1705_v56 = vmul.f32 %v812_v27, %v1702_v31 }
 0x158   :  { %912 = vperm.xlu2 %1003, %v1470_v51   ;;  %908 = vperm.xlu1 %1002, %v1297_v5   ;;  %v661_v22 = vpop.permute.xlu1 %660  ;;  %v1709_v35 = vpop.permute.xlu2 %710 }
 0x15e   :  { %v824_v17 = vpop.permute.xlu0 %823 }
 0x15f   :  { %v1714_v7 = vmul.f32 %v824_v17, %v1711_v57 }
 0x160   :  { %924 = vperm.xlu2 %1003, %v1488_v63   ;;  %920 = vperm.xlu1 %1002, %v1315_v23   ;;  %v676_v4 = vpop.permute.xlu1 %675  ;;  %v1718_v46 = vpop.permute.xlu2 %725 }
 0x167   :  { %v288_v51 = vpop.permute.xlu0 %287 }
 0x168   :  { %v351_v5 = vmul.f32 %v1389_v28, %v288_v51  ;;  %932 = vperm.xlu1 %1002, %v1338_v47   ;;  %v691_v16 = vpop.permute.xlu1 %690 }
 0x169   :  { %v776_v12 = vpop.permute.xlu2 %775 }
 0x16a   :  { %v367_v40 = vadd.f32 %v351_v5, %v1319_v26 }
 0x16c   :  { %v463_v62 = vadd.f32 %v1465_v8, %v367_v40  ;;  %v577_v8 = vmul.f32 %v1654_v32, %v1426_v60 }
 0x16e   :  { %1026 = vtanh.f32 %v463_v62 }
 0x16f   :  { %v308_v29 = vpop.permute.xlu0 %307 }
 0x170   :  { %v356_v63 = vmul.f32 %v1389_v28, %v308_v29  ;;  %v1725_v6 = vpop.permute.xlu1 %705 }
 0x171   :  { %v788_v38 = vpop.permute.xlu2 %787 }
 0x172   :  { %v372_v23 = vadd.f32 %v356_v63, %v1360_v1  ;;  %v625_v1 = vmul.f32 %v1603_v49, %v1603_v49 }
 0x174   :  { %v1027_v34 = vpop.eup %1026  ;;  %v468_v47 = vadd.f32 %v1508_v30, %v372_v23  ;;  %v1751_v40 = vsub.f32 1.0, %v625_v1 }
 0x175   :  { %v575_v41 = vmul.f32 %v1027_v34, %v1624_v13  ;;  %v621_v26 = vmul.f32 %v1027_v34, %v1027_v34  ;;  %v734_v13 = vmul.f32 %v661_v22, %v1734_v11 }
 0x176   :  { %1028 = vtanh.f32 %v468_v47 }
 0x177   :  { %v591_v48 = vadd.f32 %v1591_v54, %v575_v41  ;;  %v320_v52 = vpop.permute.xlu0 %319  ;;  %v1737_v27 = vsub.f32 1.0, %v621_v26  ;;  %v735_v54 = vmul.f32 %v1664_v53, %v1674_v43  ;;  %v835_v41 = vmul.f32 %v776_v12, %v1734_v11 }
 0x178   :  { %v359_v30 = vmul.f32 %v1389_v28, %v320_v52  ;;  %v1742_v20 = vpop.permute.xlu1 %720 }
 0x179   :  { %v592_v17 = vadd.f32 %v591_v48, %v577_v8  ;;  %v733_v60 = vmul.f32 %v1521_v42, %v1737_v27  ;;  %v796_v26 = vpop.permute.xlu2 %795 }
 0x17a   :  { %v375_v32 = vadd.f32 %v359_v30, %v1380_v21  ;;  %v737_v21 = vmul.f32 %v676_v4, %v1751_v40 }
 0x17b   :  { %v593_v51 = vadd.f32 %v592_v17, %v1638_v2  ;;  %v749_v5 = vadd.f32 %v734_v13, %v733_v60 }
 0x17c   :  { %v1029_v49 = vpop.eup %1028  ;;  %v471_v62 = vadd.f32 %v1526_v59, %v375_v32 }
 0x17d   :  { %v580_v29 = vmul.f32 %v1029_v49, %v1447_v18  ;;  %v594_v22 = vadd.f32 %v593_v51, %v1608_v10  ;;  %v750_v63 = vadd.f32 %v749_v5, %v735_v54  ;;  %v626_v23 = vmul.f32 %v1029_v49, %v1029_v49 }
 0x17e   :  { %1030 = vtanh.f32 %v471_v62  ;;  %v1883_v62 = vld [vmem:[#allocation6_spill] sm:$0xff] }
 0x17f   :  { %v595_v42 = vadd.f32 %v594_v22, %v580_v29  ;;  %v332_v50 = vpop.permute.xlu0 %331  ;;  %v1757_v53 = vsub.f32 1.0, %v626_v23  ;;  %v751_v2 = vadd.f32 %v750_v63, %v1543_v25  ;;  %v838_v23 = vmul.f32 %v788_v38, %v1751_v40 }
 0x180   :  { %v362_v34 = vmul.f32 %v1389_v28, %v332_v50 }
 0x181   :  { %v596_v47 = vadd.f32 %v595_v42, %v1651_v3  ;;  %v772_v59 = vpop.permute.xlu1 %771  ;;  %v738_v18 = vmul.f32 %v1682_v19, %v1757_v53  ;;  %v752_v10 = vadd.f32 %v751_v2, %v737_v21  ;;  %v740_v3 = vmul.f32 %v691_v16, %v1688_v15  ;;  %v1881_v19 = vld [vmem:[#allocation8_spill] sm:$0xff]  ;;  %v808_v21 = vpop.permute.xlu2 %807  ;;  %v1884_v42 = vld [vmem:[#allocation9_spill] sm:$0xff] }
 0x182   :  { %v378_v4 = vadd.f32 %v362_v34, %v1398_v44  ;;  %v834_v8 = vmul.f32 %v772_v59, %v1737_v27  ;;  %v1885_v2 = vld [vmem:[#allocation4_spill] sm:$0xff] }
 0x183   :  { %v597_v48 = vadd.f32 %v596_v47, %v1656_v58  ;;  %v753_v52 = vadd.f32 %v752_v10, %v738_v18 }
 0x184   :  { %v1031_v25 = vpop.eup %1030  ;;  %v474_v1 = vadd.f32 %v1547_v0, %v378_v4  ;;  %v850_v30 = vadd.f32 %v835_v41, %v834_v8 }
 0x185   :  { %v583_v13 = vmul.f32 %v1031_v25, %v1462_v37  ;;  %v754_v17 = vadd.f32 %v753_v52, %v1881_v19  ;;  %v629_v60 = vmul.f32 %v1031_v25, %v1031_v25  ;;  %v1882_v37 = vld [vmem:[#allocation3_spill] sm:$0xff]  ;;  %v1888_v19 = vld [vmem:[#allocation5_spill] sm:$0xff] }
 0x186   :  { %1032 = vtanh.f32 %v474_v1  ;;  %v851_v12 = vadd.f32 %v850_v30, %v1679_v36  ;;  %v1887_v1 = vld [vmem:[#allocation7_spill] sm:$0xff] }
 0x187   :  { %v598_v44 = vadd.f32 %v597_v48, %v583_v13  ;;  %v344_v32 = vpop.permute.xlu0 %343  ;;  %v1773_v54 = vsub.f32 1.0, %v629_v60  ;;  %v755_v58 = vadd.f32 %v754_v17, %v740_v3  ;;  %v840_v30 = vmul.f32 %v796_v26, %v1887_v1  ;;  %v1889_v60 = vld [vmem:[#allocation13_spill] sm:$0xff] }
 0x188   :  { %v365_v51 = vmul.f32 %v1389_v28, %v344_v32  ;;  %v746_v13 = vmul.f32 %v1742_v20, %v1711_v57 }
 0x189   :  { %v599_v0 = vadd.f32 %v598_v44, %v1672_v45  ;;  %v784_v5 = vpop.permute.xlu1 %783  ;;  %v741_v16 = vmul.f32 %v1696_v14, %v1773_v54  ;;  %v743_v45 = vmul.f32 %v1725_v6, %v1702_v31  ;;  %v1886_v14 = vld [vmem:[#allocation11_spill] sm:$0xff]  ;;  %v820_v44 = vpop.permute.xlu2 %819 }
 0x18a   :  { %v381_v49 = vadd.f32 %v365_v51, %v1882_v37  ;;  %v837_v29 = vmul.f32 %v784_v5, %v1883_v62 }
 0x18b   :  { %v600_v22 = vadd.f32 %v599_v0, %v1676_v9  ;;  %v756_v36 = vadd.f32 %v755_v58, %v741_v16 }
 0x18c   :  { %v1033_v63 = vpop.eup %1032  ;;  %v477_v50 = vadd.f32 %v1884_v42, %v381_v49  ;;  %v852_v28 = vadd.f32 %v851_v12, %v837_v29  ;;  %v1890_v49 = vld [vmem:[#allocation10_spill] sm:$0xff] }
 0x18d   :  { %v586_v34 = vmul.f32 %v1033_v63, %v1885_v2  ;;  %v757_v47 = vadd.f32 %v756_v36, %v1886_v14  ;;  %v632_v59 = vmul.f32 %v1033_v63, %v1033_v63  ;;  %v843_v29 = vmul.f32 %v808_v21, %v1890_v49  ;;  %v1891_v63 = vld [vmem:[#allocation15_spill] sm:$0xff] }
 0x18e   :  { %1034 = vtanh.f32 %v477_v50  ;;  %v853_v18 = vadd.f32 %v852_v28, %v838_v23 }
 0x18f   :  { %v601_v10 = vadd.f32 %v600_v22, %v586_v34  ;;  %v1788_v9 = vsub.f32 1.0, %v632_v59  ;;  %v758_v41 = vadd.f32 %v757_v47, %v743_v45  ;;  %v1892_v59 = vld [vmem:[#allocation12_spill] sm:$0xff] }
 0x191   :  { %v602_v38 = vadd.f32 %v601_v10, %v1686_v61  ;;  %v792_v4 = vpop.permute.xlu1 %791  ;;  %v744_v8 = vmul.f32 %v1709_v35, %v1788_v9  ;;  %v618_v10 = vperm.slane %v1646_v55, 0 }
 0x192   :  { %v839_v48 = vmul.f32 %v792_v4, %v1757_v53 }
 0x193   :  { %v603_v6 = vadd.f32 %v602_v38, %v1690_v39  ;;  %v759_v52 = vadd.f32 %v758_v41, %v744_v8 }
 0x194   :  { %v1035_v25 = vpop.eup %1034  ;;  %v854_v3 = vadd.f32 %v853_v18, %v839_v48  ;;  %v846_v18 = vmul.f32 %v820_v44, %v1892_v59 }
 0x195   :  { %v589_v17 = vmul.f32 %v1035_v25, %v1888_v19  ;;  %v760_v61 = vadd.f32 %v759_v52, %v1889_v60  ;;  %v635_v12 = vmul.f32 %v1035_v25, %v1035_v25  ;;  %v1893_v19 = vld [vmem:[#allocation14_spill] sm:$0xff] }
 0x196   :  { %v855_v32 = vadd.f32 %v854_v3, %v840_v30 }
 0x197   :  { %v604_v35 = vadd.f32 %v603_v6, %v589_v17  ;;  %v1800_v58 = vsub.f32 1.0, %v635_v12  ;;  %v761_v51 = vadd.f32 %v760_v61, %v746_v13  ;;  %v873_v13 = vpop.permute.xlu0 %872 }
 0x198   :  { %v856_v39 = vadd.f32 %v855_v32, %v1693_v33  ;;  %v832_v33 = vpop.permute.xlu2 %831  ;;  %v935_v44 = vmul.f32 %v873_v13, %v1737_v27 }
 0x199   :  { %v605_v0 = vadd.f32 %v604_v35, %v1700_v24  ;;  %v804_v26 = vpop.permute.xlu1 %803  ;;  %v747_v5 = vmul.f32 %v1718_v46, %v1800_v58  ;;  %v849_v55 = vmul.f32 %v832_v33, %v1893_v19 }
 0x19a   :  { %v842_v20 = vmul.f32 %v804_v26, %v1773_v54 }
 0x19b   :  { %v606_v16 = vrot.slane %v605_v0, 4  ;;  %v762_v37 = vadd.f32 %v761_v51, %v747_v5 }
 0x19c   :  { %v857_v22 = vadd.f32 %v856_v39, %v842_v20 }
 0x19d   :  { %v607_v36 = vadd.f32 %v606_v16, %v605_v0  ;;  %v763_v23 = vadd.f32 %v762_v37, %v1891_v63 }
 0x19e   :  { %v858_v42 = vadd.f32 %v857_v22, %v843_v29 }
 0x19f   :  { %v608_v50 = vrot.slane %v607_v36, 2  ;;  %v764_v28 = vrot.slane %v763_v23, 4  ;;  %v893_v26 = vpop.permute.xlu0 %892 }
 0x1a0   :  { %v859_v24 = vadd.f32 %v858_v42, %v1705_v56  ;;  %v881_v25 = vpop.permute.xlu2 %880 }
 0x1a1   :  { %v609_v45 = vadd.f32 %v608_v50, %v607_v36  ;;  %v816_v2 = vpop.permute.xlu1 %815  ;;  %v765_v34 = vadd.f32 %v764_v28, %v763_v23  ;;  %v937_v39 = vmul.f32 %v881_v25, %v1674_v43  ;;  %v940_v43 = vmul.f32 %v893_v26, %v1757_v53 }
 0x1a2   :  { %v845_v46 = vmul.f32 %v816_v2, %v1788_v9 }
 0x1a3   :  { %v610_v14 = vrot.slane %v609_v45, 1  ;;  %v766_v47 = vrot.slane %v765_v34, 2 }
 0x1a4   :  { %v860_v21 = vadd.f32 %v859_v24, %v845_v46 }
 0x1a5   :  { %v611_v41 = vadd.f32 %v610_v14, %v609_v45  ;;  %v767_v38 = vadd.f32 %v766_v47, %v765_v34 }
 0x1a6   :  { %v861_v4 = vadd.f32 %v860_v21, %v846_v18 }
 0x1a7   :  { %v619_v8 = vadd.f32 %v618_v10, %v611_v41  ;;  %v768_v48 = vrot.slane %v767_v38, 1  ;;  %v905_v42 = vpop.permute.xlu0 %904 }
 0x1a8   :  { %v862_v6 = vadd.f32 %v861_v4, %v1714_v7  ;;  %v889_v35 = vpop.permute.xlu2 %888  ;;  %v943_v45 = vmul.f32 %v905_v42, %v1773_v54 }
 0x1a9   :  { %620 = vst [vmem:[%s1850_s7] sm:$0x1] %v619_v8  ;;  %v828_v56 = vpop.permute.xlu1 %827  ;;  %v769_v52 = vadd.f32 %v768_v48, %v767_v38  ;;  %v939_v63 = vmul.f32 %v889_v35, %v1751_v40 }
 0x1aa   :  { %v848_v30 = vmul.f32 %v828_v56, %v1800_v58 }
 0x1ab   :  { %v972_v3 = vsub.f32 0.0, %v769_v52 }
 0x1ac   :  { %v863_v17 = vadd.f32 %v862_v6, %v848_v30 }
 0x1ad   :  { %973 = vst [vmem:[%s1851_s6] sm:$0x1] %v972_v3 }
 0x1ae   :  { %v864_v60 = vadd.f32 %v863_v17, %v849_v55 }
 0x1af   :  { %v917_v46 = vpop.permute.xlu0 %916 }
 0x1b0   :  { %v865_v7 = vrot.slane %v864_v60, 4  ;;  %v946_v21 = vmul.f32 %v917_v46, %v1788_v9 }
 0x1b2   :  { %v866_v61 = vadd.f32 %v865_v7, %v864_v60  ;;  %v877_v12 = vpop.permute.xlu1 %876 }
 0x1b3   :  { %v936_v32 = vmul.f32 %v877_v12, %v1734_v11  ;;  %v901_v11 = vpop.permute.xlu2 %900 }
 0x1b4   :  { %v867_v51 = vrot.slane %v866_v61, 2  ;;  %v942_v24 = vmul.f32 %v901_v11, %v1688_v15 }
 0x1b5   :  { %v951_v0 = vadd.f32 %v936_v32, %v935_v44 }
 0x1b6   :  { %v868_v5 = vadd.f32 %v867_v51, %v866_v61 }
 0x1b7   :  { %v952_v20 = vadd.f32 %v951_v0, %v937_v39  ;;  %v929_v4 = vpop.permute.xlu0 %928 }
 0x1b8   :  { %v869_v16 = vrot.slane %v868_v5, 1  ;;  %v949_v48 = vmul.f32 %v929_v4, %v1800_v58 }
 0x1ba   :  { %v870_v37 = vadd.f32 %v869_v16, %v868_v5  ;;  %v885_v29 = vpop.permute.xlu1 %884 }
 0x1bb   :  { %v938_v22 = vmul.f32 %v885_v29, %v1883_v62  ;;  %v913_v2 = vpop.permute.xlu2 %912 }
 0x1bc   :  { %v974_v36 = vsub.f32 0.0, %v870_v37  ;;  %v945_v53 = vmul.f32 %v913_v2, %v1702_v31 }
 0x1bd   :  { %v953_v23 = vadd.f32 %v952_v20, %v938_v22 }
 0x1be   :  { %975 = vst [vmem:[%s1851_s6 + $0x1] sm:$0x1] %v974_v36 }
 0x1bf   :  { %v954_v27 = vadd.f32 %v953_v23, %v939_v63 }
 0x1c1   :  { %v955_v50 = vadd.f32 %v954_v27, %v940_v43 }
 0x1c2   :  { %v897_v28 = vpop.permute.xlu1 %896 }
 0x1c3   :  { %v941_v33 = vmul.f32 %v897_v28, %v1887_v1  ;;  %v925_v1 = vpop.permute.xlu2 %924 }
 0x1c4   :  { %v948_v54 = vmul.f32 %v925_v1, %v1711_v57 }
 0x1c5   :  { %v956_v62 = vadd.f32 %v955_v50, %v941_v33 }
 0x1c7   :  { %v957_v40 = vadd.f32 %v956_v62, %v942_v24 }
 0x1c9   :  { %v958_v34 = vadd.f32 %v957_v40, %v943_v45 }
 0x1ca   :  { %v909_v14 = vpop.permute.xlu1 %908 }
 0x1cb   :  { %v944_v47 = vmul.f32 %v909_v14, %v1890_v49 }
 0x1cd   :  { %v959_v18 = vadd.f32 %v958_v34, %v944_v47 }
 0x1cf   :  { %v960_v10 = vadd.f32 %v959_v18, %v945_v53 }
 0x1d1   :  { %v961_v41 = vadd.f32 %v960_v10, %v946_v21 }
 0x1d2   :  { %v921_v38 = vpop.permute.xlu1 %920 }
 0x1d3   :  { %v947_v15 = vmul.f32 %v921_v38, %v1892_v59 }
 0x1d5   :  { %v962_v8 = vadd.f32 %v961_v41, %v947_v15 }
 0x1d7   :  { %v963_v6 = vadd.f32 %v962_v8, %v948_v54 }
 0x1d9   :  { %v964_v56 = vadd.f32 %v963_v6, %v949_v48 }
 0x1da   :  { %v933_v49 = vpop.permute.xlu1 %932 }
 0x1db   :  { %v950_v31 = vmul.f32 %v933_v49, %v1893_v19 }
 0x1dd   :  { %v965_v52 = vadd.f32 %v964_v56, %v950_v31 }
 0x1df   :  { %v966_v25 = vrot.slane %v965_v52, 4 }
 0x1e1   :  { %v967_v9 = vadd.f32 %v966_v25, %v965_v52 }
 0x1e3   :  { %v968_v30 = vrot.slane %v967_v9, 2 }
 0x1e5   :  { %v969_v3 = vadd.f32 %v968_v30, %v967_v9 }
 0x1e7   :  { %v970_v13 = vrot.slane %v969_v3, 1 }
 0x1e9   :  { %v971_v55 = vadd.f32 %v970_v13, %v969_v3 }
 0x1eb   :  { %v976_v17 = vsub.f32 0.0, %v971_v55 }
 0x1ed   :  { %977 = vst [vmem:[%s1851_s6 + $0x2] sm:$0x1] %v976_v17 }

</bundles_post_ra>
